<compile_context>
chip_gen: v7x
topology: tpu7x:2x2x1
jax: 0.10.0
libtpu: 0.0.40
codegen_flags: <defaults>
</compile_context>

<pallas_src>
import math
import functools

import jax
import jax.numpy as jnp
from jax.experimental import pallas as pl
from jax.experimental.pallas import tpu as pltpu

BN_EPS = 1e-5
LANE = 128
SUBLANE = 8


def _round_up(x: int, m: int) -> int:
    return ((x + m - 1) // m) * m


# ----------------------------------------------------------------------------
# Kernel
# ----------------------------------------------------------------------------
def _make_kernel(num_layers: int):
    """Kernel refs: x_tile, bias_stack, W_0..W_{L-1}, out_tile.

    x_tile:     (TILE_N, D0_pad) bf16
    bias_stack: (L, max_Dout_pad) f32   (BN already folded in)
    W_i:        (Din_pad, Dout_pad) bf16 (BN already folded in)
    out_tile:   (TILE_N, DL_pad) f32
    """

    def kernel(*refs):
        x_ref, b_ref = refs[0], refs[1]
        w_refs = refs[2 : 2 + num_layers]
        out_ref = refs[2 + num_layers]

        h_lo = x_ref[...]  # bf16 operand for the first matmul
        h = None
        for i, w_ref in enumerate(w_refs):
            d_out = w_ref.shape[1]
            # MXU: bf16 x bf16 -> f32 accumulation.
            h = jnp.dot(h_lo, w_ref[...], preferred_element_type=jnp.float32)
            h = h + b_ref[i : i + 1, :d_out]  # f32 bias (BN folded)
            if i < num_layers - 1:
                h = jnp.maximum(h, 0.0)        # ReLU; BN folded; dropout(eval)=identity
                h_lo = h.astype(jnp.bfloat16)  # next MXU operand
        out_ref[...] = h

    return kernel


# ----------------------------------------------------------------------------
# pallas_call builder (cached so the closure isn't rebuilt per call)
# ----------------------------------------------------------------------------
@functools.lru_cache(maxsize=None)
def _build_pallas_call(n_pad, tile_n, weight_shapes, bias_shape):
    num_layers = len(weight_shapes)
    d_in_p = weight_shapes[0][0]
    d_out_p = weight_shapes[-1][1]

    in_specs = [
        # Batch tiles of x pipeline against compute.
        pl.BlockSpec((tile_n, d_in_p), lambda i: (i, 0)),
        # Bias stack: single block, VMEM-resident across the whole grid.
        pl.BlockSpec(bias_shape, lambda i: (0, 0)),
    ]
    # Weights: full-array blocks with constant index_map -> stay VMEM-resident.
    for din, dout in weight_shapes:
        in_specs.append(pl.BlockSpec((din, dout), lambda i: (0, 0)))
    out_specs = pl.BlockSpec((tile_n, d_out_p), lambda i: (i, 0))

    # VMEM budget: resident bf16 weights + f32 bias stack + double-buffered bf16 x tiles
    # + double-buffered f32 out tiles + activation temporaries + headroom.
    # Clamp to v7x's 64 MiB physical VMEM.
    max_d = max(max(din, dout) for din, dout in weight_shapes)
    vmem_bytes = (
        sum(din * dout * 2 for din, dout in weight_shapes)   # bf16 weights
        + bias_shape[0] * bias_shape[1] * 4                   # f32 bias stack
        + 2 * tile_n * d_in_p * 2                             # x tiles (bf16, 2 bufs)
        + 2 * tile_n * d_out_p * 4                            # out tiles (f32, 2 bufs)
        + 4 * tile_n * max_d * 4                              # activation temporaries
        + (1 << 20)                                           # headroom
    )
    vmem_limit = min(64 * 1024 * 1024, max(vmem_bytes, 16 * 1024 * 1024))

    return pl.pallas_call(
        _make_kernel(num_layers),
        out_shape=jax.ShapeDtypeStruct((n_pad, d_out_p), jnp.float32),
        grid=(n_pad // tile_n,),
        in_specs=in_specs,
        out_specs=out_specs,
        compiler_params=pltpu.CompilerParams(
            dimension_semantics=("parallel",),  # shard batch axis across TCs on v7x
            vmem_limit_bytes=vmem_limit,
        ),
    )


# ----------------------------------------------------------------------------
# Forward wrapper
# ----------------------------------------------------------------------------
@functools.partial(jax.jit, static_argnames=("out_dim",))
def _mlp_forward_impl(x, bias_stack, weights, *, out_dim):
    n, d_in = x.shape
    d_in_p = weights[0].shape[0]

    # Batch tiling: large batches use 512-row tiles; tiny batches just round to sublanes.
    tile_n = 512 if n >= 512 else _round_up(max(n, 1), SUBLANE)
    n_pad = _round_up(n, tile_n)

    # Pad batch/feature dims and cast the streamed input to bf16 (halves x DMA bytes;
    # first matmul is bf16 x bf16 with f32 accumulation anyway).
    x_pad = (
        jnp.zeros((n_pad, d_in_p), jnp.bfloat16)
        .at[:n, :d_in]
        .set(x.astype(jnp.bfloat16))
    )

    weight_shapes = tuple(tuple(w.shape) for w in weights)
    call = _build_pallas_call(n_pad, tile_n, weight_shapes, tuple(bias_stack.shape))
    out_pad = call(x_pad, bias_stack, *weights)
    return out_pad[:n, :out_dim]


def mlp_forward(x, fused):
    return _mlp_forward_impl(
        x, fused["bias_stack"], fused["weights"], out_dim=fused["out_dim"]
    )


# ----------------------------------------------------------------------------
# Parameter init (mirrors PyTorch MLP.__init__) and fuse/pad prep
# ----------------------------------------------------------------------------
def init_raw_params(key, input_dim, mlp_dims):
    """Raw params mirroring the PyTorch module (weights stored (out, in) like nn.Linear)."""
    last_dim = mlp_dims[-1]
    hidden_dims = mlp_dims[:-1]

    params = {"hidden": []}
    prev = input_dim
    for d in hidden_dims:
        key, kw, kb = jax.random.split(key, 3)
        std = math.sqrt(2.0 / d)  # kaiming_normal_(a=0, mode='fan_out')
        w = jax.random.normal(kw, (d, prev), dtype=jnp.float32) * std
        bound = 1.0 / math.sqrt(prev)  # default nn.Linear bias init
        b = jax.random.uniform(kb, (d,), dtype=jnp.float32, minval=-bound, maxval=bound)
        params["hidden"].append(
            {
                "w": w,
                "b": b,
                "gamma": jnp.ones((d,), jnp.float32),
                "beta": jnp.zeros((d,), jnp.float32),
                "mean": jnp.zeros((d,), jnp.float32),
                "var": jnp.ones((d,), jnp.float32),
            }
        )
        prev = d

    key, kw, kb = jax.random.split(key, 3)
    std = math.sqrt(2.0 / last_dim)
    w_last = jax.random.normal(kw, (last_dim, prev), dtype=jnp.float32) * std
    bound = 1.0 / math.sqrt(prev)
    b_last = jax.random.uniform(
        kb, (last_dim,), dtype=jnp.float32, minval=-bound, maxval=bound
    )
    params["w_last"] = w_last
    params["b_last"] = b_last
    return params


def fuse_and_pad_params(raw):
    """Fold eval-mode BN into the following Linear, pad feature dims to 128 lanes,
    cast weights to bf16, and stack biases into a single array."""
    # 1) BN fold (BN follows ReLU -> fold into the NEXT layer's W/b).
    layers = []
    prev_a = prev_c = None
    for layer in raw["hidden"]:
        W = layer["w"].T  # (in, out) so the kernel computes h @ W
        b = layer["b"]
        if prev_a is not None:
            b = prev_c @ W + b
            W = prev_a[:, None] * W
        layers.append((W, b))
        a = layer["gamma"] * jax.lax.rsqrt(layer["var"] + BN_EPS)
        c = layer["beta"] - layer["mean"] * a
        prev_a, prev_c = a, c

    W = raw["w_last"].T
    b = raw["b_last"]
    if prev_a is not None:
        b = prev_c @ W + b
        W = prev_a[:, None] * W
    layers.append((W, b))

    # 2) Zero-pad feature dims to 128-lane multiples; weights -> bf16.
    padded_w = []
    bias_rows = []
    for W, bias in layers:
        din, dout = W.shape
        din_p, dout_p = _round_up(din, LANE), _round_up(dout, LANE)
        Wp = jnp.zeros((din_p, dout_p), jnp.float32).at[:din, :dout].set(W)
        padded_w.append(Wp.astype(jnp.bfloat16))
        bias_rows.append(bias)

    max_out_p = max(w.shape[1] for w in padded_w)
    bias_stack = jnp.zeros((len(layers), max_out_p), jnp.float32)
    for i, bias in enumerate(bias_rows):
        bias_stack = bias_stack.at[i, : bias.shape[0]].set(bias)

    return {
        "weights": tuple(padded_w),
        "bias_stack": bias_stack,
        "in_dim": layers[0][0].shape[0],
        "out_dim": layers[-1][0].shape[1],
    }


# ----------------------------------------------------------------------------
# Pure-JAX reference (eval-mode forward of the PyTorch module)
# ----------------------------------------------------------------------------
def mlp_reference(x, raw):
    h = x
    for layer in raw["hidden"]:
        h = h @ layer["w"].T + layer["b"]
        h = jnp.maximum(h, 0.0)
        h = (h - layer["mean"]) * jax.lax.rsqrt(layer["var"] + BN_EPS) * layer[
            "gamma"
        ] + layer["beta"]
        # Dropout in eval mode: identity.
    return h @ raw["w_last"].T + raw["b_last"]


if __name__ == "__main__":
    # Shapes consistent with MLP(input_dim=32, mlp_dims=[64, 48, 16]) on a batch of 8.
    batch = 8
    input_dim = 32
    mlp_dims = [64, 48, 16]

    key = jax.random.PRNGKey(0)
    key, kx = jax.random.split(key)
    x = jax.random.normal(kx, (batch, input_dim), dtype=jnp.float32)

    raw = init_raw_params(key, input_dim, mlp_dims)
    fused = fuse_and_pad_params(raw)

    out = mlp_forward(x, fused)
    out = jax.block_until_ready(out)

    ref = mlp_reference(x, raw)
    assert out.shape == (batch, mlp_dims[-1]), out.shape
    # bf16 weight/activation operands with f32 accumulation -> relaxed tolerance.
    assert jnp.allclose(out, ref, atol=5e-2, rtol=5e-2), float(
        jnp.max(jnp.abs(out - ref))
    )

    print("KERNEL_OK")
</pallas_src>

<mosaic_0001>
module attributes {stable_mosaic.version = 11 : i64} {
  func.func @kernel(%arg0: i32, %arg1: memref<8x128xbf16, #tpu.memory_space<vmem>>, %arg2: memref<3x128xf32, #tpu.memory_space<vmem>>, %arg3: memref<128x128xbf16, #tpu.memory_space<vmem>>, %arg4: memref<128x128xbf16, #tpu.memory_space<vmem>>, %arg5: memref<128x128xbf16, #tpu.memory_space<vmem>>, %arg6: memref<8x128xf32, #tpu.memory_space<vmem>>) attributes {dimension_semantics = [#tpu.dimension_semantics<parallel>], iteration_bounds = array<i64: 1>, scalar_prefetch = 0 : i64, scratch_operands = 0 : i64, tpu.core_type = #tpu.core_type<tc>, window_params = [{transform_indices = @transform_0, window_bounds = array<i64: 8, 128>}, {pipeline_mode = #tpu.pipeline_mode<synchronous>, transform_indices = @transform_1, window_bounds = array<i64: 3, 128>}, {pipeline_mode = #tpu.pipeline_mode<synchronous>, transform_indices = @transform_2, window_bounds = array<i64: 128, 128>}, {pipeline_mode = #tpu.pipeline_mode<synchronous>, transform_indices = @transform_3, window_bounds = array<i64: 128, 128>}, {pipeline_mode = #tpu.pipeline_mode<synchronous>, transform_indices = @transform_4, window_bounds = array<i64: 128, 128>}, {transform_indices = @transform_5, window_bounds = array<i64: 8, 128>}]} {
    %c0 = arith.constant 0 : index
    %c0_0 = arith.constant 0 : index
    %0 = vector.load %arg1[%c0, %c0_0] : memref<8x128xbf16, #tpu.memory_space<vmem>>, vector<8x128xbf16>
    %c0_1 = arith.constant 0 : index
    %c0_2 = arith.constant 0 : index
    %1 = vector.load %arg3[%c0_1, %c0_2] : memref<128x128xbf16, #tpu.memory_space<vmem>>, vector<128x128xbf16>
    %cst = arith.constant dense<0.000000e+00> : vector<8x128xf32>
    %2 = tpu.matmul %0, %1, %cst {dimension_numbers = #tpu.dot_dimension_numbers<[1], [0], [0], [1], [0, 0, 1, 1], [], []>} : vector<8x128xbf16>, vector<128x128xbf16>, vector<8x128xf32> -> vector<8x128xf32>
    %c0_3 = arith.constant 0 : index
    %c0_4 = arith.constant 0 : index
    %3 = vector.load %arg2[%c0_3, %c0_4] : memref<3x128xf32, #tpu.memory_space<vmem>>, vector<1x128xf32>
    %4 = vector.broadcast %3 : vector<1x128xf32> to vector<8x128xf32>
    %5 = arith.addf %2, %4 : vector<8x128xf32>
    %cst_5 = arith.constant 0.000000e+00 : f32
    %6 = vector.broadcast %cst_5 : f32 to vector<8x128xf32>
    %7 = arith.maximumf %5, %6 : vector<8x128xf32>
    %8 = arith.truncf %7 : vector<8x128xf32> to vector<8x128xbf16>
    %c0_6 = arith.constant 0 : index
    %c0_7 = arith.constant 0 : index
    %9 = vector.load %arg4[%c0_6, %c0_7] : memref<128x128xbf16, #tpu.memory_space<vmem>>, vector<128x128xbf16>
    %cst_8 = arith.constant dense<0.000000e+00> : vector<8x128xf32>
    %10 = tpu.matmul %8, %9, %cst_8 {dimension_numbers = #tpu.dot_dimension_numbers<[1], [0], [0], [1], [0, 0, 1, 1], [], []>} : vector<8x128xbf16>, vector<128x128xbf16>, vector<8x128xf32> -> vector<8x128xf32>
    %c1 = arith.constant 1 : index
    %c0_9 = arith.constant 0 : index
    %11 = vector.load %arg2[%c1, %c0_9] : memref<3x128xf32, #tpu.memory_space<vmem>>, vector<1x128xf32>
    %12 = vector.broadcast %11 : vector<1x128xf32> to vector<8x128xf32>
    %13 = arith.addf %10, %12 : vector<8x128xf32>
    %cst_10 = arith.constant 0.000000e+00 : f32
    %14 = vector.broadcast %cst_10 : f32 to vector<8x128xf32>
    %15 = arith.maximumf %13, %14 : vector<8x128xf32>
    %16 = arith.truncf %15 : vector<8x128xf32> to vector<8x128xbf16>
    %c0_11 = arith.constant 0 : index
    %c0_12 = arith.constant 0 : index
    %17 = vector.load %arg5[%c0_11, %c0_12] : memref<128x128xbf16, #tpu.memory_space<vmem>>, vector<128x128xbf16>
    %cst_13 = arith.constant dense<0.000000e+00> : vector<8x128xf32>
    %18 = tpu.matmul %16, %17, %cst_13 {dimension_numbers = #tpu.dot_dimension_numbers<[1], [0], [0], [1], [0, 0, 1, 1], [], []>} : vector<8x128xbf16>, vector<128x128xbf16>, vector<8x128xf32> -> vector<8x128xf32>
    %c2 = arith.constant 2 : index
    %c0_14 = arith.constant 0 : index
    %19 = vector.load %arg2[%c2, %c0_14] : memref<3x128xf32, #tpu.memory_space<vmem>>, vector<1x128xf32>
    %20 = vector.broadcast %19 : vector<1x128xf32> to vector<8x128xf32>
    %21 = arith.addf %18, %20 : vector<8x128xf32>
    %c0_15 = arith.constant 0 : index
    %c0_16 = arith.constant 0 : index
    %22 = vector.load %arg6[%c0_15, %c0_16] : memref<8x128xf32, #tpu.memory_space<vmem>>, vector<8x128xf32>
    tpu.vector_store %arg6[%c0_15, %c0_16], %21 {strides = array<i32>} : memref<8x128xf32, #tpu.memory_space<vmem>>, vector<8x128xf32>,
    return
  }
  func.func @transform_0(%arg0: i32) -> (i32, i32) {
    %c0_i32 = arith.constant 0 : i32
    %c0_i32_0 = arith.constant 0 : i32
    return %arg0, %c0_i32 : i32, i32
  }
  func.func @transform_1(%arg0: i32) -> (i32, i32) {
    %c0_i32 = arith.constant 0 : i32
    %c0_i32_0 = arith.constant 0 : i32
    %c0_i32_1 = arith.constant 0 : i32
    return %c0_i32, %c0_i32_0 : i32, i32
  }
  func.func @transform_2(%arg0: i32) -> (i32, i32) {
    %c0_i32 = arith.constant 0 : i32
    %c0_i32_0 = arith.constant 0 : i32
    %c0_i32_1 = arith.constant 0 : i32
    return %c0_i32, %c0_i32_0 : i32, i32
  }
  func.func @transform_3(%arg0: i32) -> (i32, i32) {
    %c0_i32 = arith.constant 0 : i32
    %c0_i32_0 = arith.constant 0 : i32
    %c0_i32_1 = arith.constant 0 : i32
    return %c0_i32, %c0_i32_0 : i32, i32
  }
  func.func @transform_4(%arg0: i32) -> (i32, i32) {
    %c0_i32 = arith.constant 0 : i32
    %c0_i32_0 = arith.constant 0 : i32
    %c0_i32_1 = arith.constant 0 : i32
    return %c0_i32, %c0_i32_0 : i32, i32
  }
  func.func @transform_5(%arg0: i32) -> (i32, i32) {
    %c0_i32 = arith.constant 0 : i32
    %c0_i32_0 = arith.constant 0 : i32
    return %arg0, %c0_i32 : i32, i32
  }
}

</mosaic_0001>

<bundles_post_ra>
// kernel: _mlp_forward_impl.1
= control target key start
LH: loop header
LB: loop body
LE: loop exit
PB: predicated region body
PF: predicated region fallthrough
CT: control target
= control target key end

     0   :  { %10 = vsyncpa [#allocation3], 0  ;;  %s796_s0 = inlined_call_operand.vmem [shape: bf16[8,128], index: 0, kind: input, shape index: {}]   ;;  %s797_s1 = inlined_call_operand.vmem [shape: f32[3,128], index: 1, kind: input, shape index: {}]   ;;  %s798_s2 = inlined_call_operand.hbm [shape: bf16[128,128], index: 2, kind: input, shape index: {}]   ;;  %s799_s3 = inlined_call_operand.hbm [shape: bf16[128,128], index: 3, kind: input, shape index: {}]   ;;  %s800_s4 = inlined_call_operand.hbm [shape: bf16[128,128], index: 4, kind: input, shape index: {}]   ;;  %s801_s5 = inlined_call_operand.hbm [shape: f32[8,128], index: 5, kind: output, shape index: {}]  }
   0x1   :  { %11 = vsyncpa [#allocation6], 0 }
   0x2   :  { %12 = vsyncpa [#allocation4], 0  ;;  %s652_s18 = smov [#allocation5]   ;;  %s653_s20 = smov [#allocation2]  }
   0x3   :  { %s34_s19 = sshll.u32 %s652_s18, 4  ;;  %s22_s21 = sshll.u32 %s653_s20, 4  ;;  %s35_s19 = int_to_ptr.vmem [resolvable:$true] %s34_s19  ;;  %s690_s21 = int_to_ptr.vmem [resolvable:$true] %s22_s21 }
   0x4   :  { %s558_s24 = scalar_lea.hbm %s799_s3, 1024 }
   0x5   :  { %p559_p0 = scmp.ne.s32.totalorder %s799_s3, %s558_s24  ;;  %p562_p1 = scmp.lt.u32.totalorder %s558_s24, %s799_s3 }
   0x7   :  { %p564_p2 = pnand %p562_p1, %p559_p0 }
   0x9   :  { %567 = shalt.err (!%p564_p2)
}
   0xa   :  { %s568_s29 = scalar_lea.vmem %s35_s19, 1024  ;;  %p573_p4 = scmp.lt.s32.totalorder %s35_s19, %s35_s19 }
   0xb   :  { %p569_p3 = scmp.ne.s32.totalorder %s35_s19, %s568_s29  ;;  %p574_p5 = scmp.lt.s32.totalorder %s568_s29, %s568_s29 }
   0xd   :  { %p575_p6 = por %p574_p5, %p573_p4 }
   0xf   :  { %p576_p7 = pnand %p575_p6, %p569_p3 }
  0x11   :  { %579 = shalt.err (!%p576_p7)
}
  0x12   :  { %s654_s30 = smov 64   ;;  %s655_s6 = smov 4  }
  0x13   :  { %40 = dma.hbm_to_vmem [thread:$0]  %s799_s3, 1024, %s35_s19, [#allocation6], %s654_s30, %s654_s30, %s655_s6  }
  0x14   :  { %s580_s11 = scalar_lea.hbm %s798_s2, 1024 }
  0x15   :  { %p581_p8 = scmp.ne.s32.totalorder %s798_s2, %s580_s11  ;;  %p584_p9 = scmp.lt.u32.totalorder %s580_s11, %s798_s2 }
  0x17   :  { %p586_p10 = pnand %p584_p9, %p581_p8 }
  0x19   :  { %589 = shalt.err (!%p586_p10)
}
  0x1a   :  { %s590_s16 = scalar_lea.vmem %s690_s21, 1024  ;;  %p595_p12 = scmp.lt.s32.totalorder %s690_s21, %s690_s21 }
  0x1b   :  { %p591_p11 = scmp.ne.s32.totalorder %s690_s21, %s590_s16  ;;  %p596_p13 = scmp.lt.s32.totalorder %s590_s16, %s590_s16 }
  0x1d   :  { %p597_p0 = por %p596_p13, %p595_p12 }
  0x1f   :  { %p598_p1 = pnand %p597_p0, %p591_p11 }
  0x21   :  { %601 = shalt.err (!%p598_p1)
}
  0x22   :  { %28 = dma.hbm_to_vmem [thread:$0]  %s798_s2, 1024, %s690_s21, [#allocation3], %s654_s30, %s654_s30, %s655_s6  }
  0x23   :  { %s656_s18 = smov [#allocation7]   ;;  %s602_s23 = scalar_lea.hbm %s800_s4, 1024 }
  0x24   :  { %s46_s19 = sshll.u32 %s656_s18, 4  ;;  %p603_p2 = scmp.ne.s32.totalorder %s800_s4, %s602_s23  ;;  %s47_s19 = int_to_ptr.vmem [resolvable:$true] %s46_s19 }
  0x25   :  { %p606_p3 = scmp.lt.u32.totalorder %s602_s23, %s800_s4 }
  0x27   :  { %p608_p4 = pnand %p606_p3, %p603_p2 }
  0x29   :  { %611 = shalt.err (!%p608_p4)
}
  0x2a   :  { %s612_s28 = scalar_lea.vmem %s47_s19, 1024  ;;  %p617_p6 = scmp.lt.s32.totalorder %s47_s19, %s47_s19 }
  0x2b   :  { %p613_p5 = scmp.ne.s32.totalorder %s47_s19, %s612_s28  ;;  %p618_p7 = scmp.lt.s32.totalorder %s612_s28, %s612_s28 }
  0x2d   :  { %p619_p8 = por %p618_p7, %p617_p6 }
  0x2f   :  { %p620_p9 = pnand %p619_p8, %p613_p5 }
  0x31   :  { %623 = shalt.err (!%p620_p9)
}
  0x32   :  { %52 = dma.hbm_to_vmem [thread:$0]  %s800_s4, 1024, %s47_s19, [#allocation6], %s654_s30, %s654_s30, %s655_s6  }
  0x33   :  { %646 = dma.done.wait [#allocation3], 1024  }
  0x34   :  { %647 = vsyncadd [#allocation3], 4294966272 }
  0x35   :  { %648 = dma.done.wait [#allocation6], 2048  }
  0x36   :  { %649 = vsyncadd [#allocation6], 4294965248  ;;  %v657_v0 = vmov 0.0   ;;  %vm658_vm0 = vmmov 0   ;;  %v534_v1 = vld [vmem:[#allocation2] sm:$0xff]   ;;  %v535_v2 = vld [vmem:[#allocation2 + $0x8] sm:$0xff]  }
  0x37   :  { %466 = vmatprep.subr.bf16.mxu0 %v657_v0  ;;  %482 = vmatprep.mubr.msk.bf16.mxu0 %vm658_vm0, %v657_v0  ;;  %v536_v3 = vld [vmem:[#allocation2 + $0x10] sm:$0xff]   ;;  %v542_v4 = vld [vmem:[#allocation5] sm:$0xff]   ;;  %v537_v5 = vld [vmem:[#allocation2 + $0x18] sm:$0xff]   ;;  %s659_s10 = smov [#allocation8]  }
  0x38   :  { %486 = vmatprep.subr.bf16.mxu1 %v657_v0  ;;  %502 = vmatprep.mubr.msk.bf16.mxu1 %vm658_vm0, %v657_v0  ;;  %v543_v6 = vld [vmem:[#allocation5 + $0x8] sm:$0xff]   ;;  %v538_v7 = vld [vmem:[#allocation2 + $0x20] sm:$0xff]   ;;  %v544_v8 = vld [vmem:[#allocation5 + $0x10] sm:$0xff]   ;;  %s402_s11 = sshll.u32 %s659_s10, 4  ;;  %s403_s11 = int_to_ptr.vmem [resolvable:$true] %s402_s11 }
  0x39   :  { %467 = vmatpush3.bf16.msra.mxu0 %v534_v1  ;;  %487 = vmatpush3.bf16.msra.mxu1 %v542_v4  ;;  %v539_v9 = vld [vmem:[#allocation2 + $0x28] sm:$0xff]   ;;  %v545_v10 = vld [vmem:[#allocation5 + $0x18] sm:$0xff]   ;;  %v540_v11 = vld [vmem:[#allocation2 + $0x30] sm:$0xff]   ;;  %s624_s12 = scalar_lea.vmem %s403_s11, 128  ;;  %p629_p11 = scmp.lt.s32.totalorder %s403_s11, %s403_s11 }
  0x3a   :  { %468 = vmatprep.subr.bf16.mxu0 %v657_v0  ;;  %488 = vmatprep.subr.bf16.mxu1 %v657_v0  ;;  %v546_v12 = vld [vmem:[#allocation5 + $0x20] sm:$0xff]   ;;  %v541_v13 = vld [vmem:[#allocation2 + $0x38] sm:$0xff]   ;;  %v547_v14 = vld [vmem:[#allocation5 + $0x28] sm:$0xff]   ;;  %p625_p10 = scmp.ne.s32.totalorder %s403_s11, %s624_s12  ;;  %p630_p12 = scmp.lt.s32.totalorder %s624_s12, %s624_s12 }
  0x3b   :  { %v63_v15 = vld [vmem:[%s796_s0] sm:$0xf]  ;;  %v548_v16 = vld [vmem:[#allocation5 + $0x30] sm:$0xff]   ;;  %v549_v17 = vld [vmem:[#allocation5 + $0x38] sm:$0xff]  }
  0x3c   :  { %v550_v18 = vld [vmem:[#allocation7] sm:$0xff]   ;;  %v551_v19 = vld [vmem:[#allocation7 + $0x8] sm:$0xff]   ;;  %v552_v20 = vld [vmem:[#allocation7 + $0x10] sm:$0xff]   ;;  %p631_p13 = por %p630_p12, %p629_p11 }
  0x3d   :  { %469 = vmatpush3.bf16.msra.mxu0 %v535_v2  ;;  %489 = vmatpush3.bf16.msra.mxu1 %v543_v6  ;;  %v553_v21 = vld [vmem:[#allocation7 + $0x18] sm:$0xff]   ;;  %v554_v22 = vld [vmem:[#allocation7 + $0x20] sm:$0xff]   ;;  %v555_v23 = vld [vmem:[#allocation7 + $0x28] sm:$0xff]  }
  0x3e   :  { %470 = vmatprep.subr.bf16.mxu0 %v657_v0  ;;  %490 = vmatprep.subr.bf16.mxu1 %v657_v0  ;;  %v412_v24 = vld [vmem:[%s797_s1] ss:$0 sm:$0xff]  ;;  %v556_v32 = vld [vmem:[#allocation7 + $0x30] sm:$0xff]   ;;  %v557_v33 = vld [vmem:[#allocation7 + $0x38] sm:$0xff]   ;;  %p632_p0 = pnand %p631_p13, %p625_p10 }
  0x3f   :  { %v421_v34 = vld [vmem:[%s797_s1 + $0x1] ss:$0 sm:$0xff]  ;;  %v430_v42 = vld [vmem:[%s797_s1 + $0x2] ss:$0 sm:$0xff] }
  0x41   :  { %471 = vmatpush3.bf16.msra.mxu0 %v536_v3  ;;  %491 = vmatpush3.bf16.msra.mxu1 %v544_v8 }
  0x42   :  { %472 = vmatprep.subr.bf16.mxu0 %v657_v0  ;;  %492 = vmatprep.subr.bf16.mxu1 %v657_v0 }
  0x45   :  { %473 = vmatpush3.bf16.msra.mxu0 %v537_v5  ;;  %493 = vmatpush3.bf16.msra.mxu1 %v545_v10 }
  0x46   :  { %474 = vmatprep.subr.bf16.mxu0 %v657_v0  ;;  %494 = vmatprep.subr.bf16.mxu1 %v657_v0 }
  0x49   :  { %475 = vmatpush3.bf16.msra.mxu0 %v538_v7  ;;  %495 = vmatpush3.bf16.msra.mxu1 %v546_v12 }
  0x4a   :  { %476 = vmatprep.subr.bf16.mxu0 %v657_v0  ;;  %496 = vmatprep.subr.bf16.mxu1 %v657_v0 }
  0x4d   :  { %477 = vmatpush3.bf16.msra.mxu0 %v539_v9  ;;  %497 = vmatpush3.bf16.msra.mxu1 %v547_v14 }
  0x4e   :  { %478 = vmatprep.subr.bf16.mxu0 %v657_v0  ;;  %498 = vmatprep.subr.bf16.mxu1 %v657_v0 }
  0x51   :  { %479 = vmatpush3.bf16.msra.mxu0 %v540_v11  ;;  %499 = vmatpush3.bf16.msra.mxu1 %v548_v16 }
  0x52   :  { %480 = vmatprep.subr.bf16.mxu0 %v657_v0  ;;  %500 = vmatprep.subr.bf16.mxu1 %v657_v0 }
  0x55   :  { %481 = vmatpush3.bf16.msra.mxu0 %v541_v13  ;;  %501 = vmatpush3.bf16.msra.mxu1 %v549_v17 }
  0x56   :  { %506 = vmatprep.subr.bf16.mxu0 %v657_v0 }
  0x58   :  { %483 = vmatmul.mubr.bf16.vlgmr.msra.gmra.mrb[0].mxu0 %v63_v15 }
  0x59   :  { %522 = vmatprep.mubr.msk.bf16.mxu0 %vm658_vm0, %v657_v0  ;;  %507 = vmatpush3.bf16.msra.mxu0 %v550_v18 }
  0x5a   :  { %508 = vmatprep.subr.bf16.mxu0 %v657_v0 }
  0x5d   :  { %509 = vmatpush3.bf16.msra.mxu0 %v551_v19 }
  0x5e   :  { %510 = vmatprep.subr.bf16.mxu0 %v657_v0 }
  0x61   :  { %511 = vmatpush3.bf16.msra.mxu0 %v552_v20 }
  0x62   :  { %512 = vmatprep.subr.bf16.mxu0 %v657_v0 }
  0x65   :  { %513 = vmatpush3.bf16.msra.mxu0 %v553_v21 }
  0x66   :  { %514 = vmatprep.subr.bf16.mxu0 %v657_v0 }
  0x69   :  { %515 = vmatpush3.bf16.msra.mxu0 %v554_v22 }
  0x6a   :  { %516 = vmatprep.subr.bf16.mxu0 %v657_v0 }
  0x6d   :  { %517 = vmatpush3.bf16.msra.mxu0 %v555_v23 }
  0x6e   :  { %518 = vmatprep.subr.bf16.mxu0 %v657_v0 }
  0x71   :  { %519 = vmatpush3.bf16.msra.mxu0 %v556_v32 }
  0x72   :  { %520 = vmatprep.subr.bf16.mxu0 %v657_v0 }
  0x75   :  { %521 = vmatpush3.bf16.msra.mxu0 %v557_v33 }
 0x12b   :  { %v167_v25 = vpop.f32.mrb[0].mxu0 }
 0x12c   :  { %v168_v26 = vadd.f32 %v412_v24, %v167_v25  ;;  %v484_v27 = vpop.f32.mrb[1].mxu0 }
 0x12d   :  { %v170_v28 = vpop.f32.mrb[2].mxu0 }
 0x12e   :  { %v173_v29 = vmax.f32 %v168_v26, 0.0  ;;  %v485_v30 = vpop.f32.mrb[3].mxu0 }
 0x130   :  { %v174_v31 = vpack.c.bf16 %v173_v29, %v173_v29 }
 0x132   :  { %503 = vmatmul.mubr.bf16.vlgmr.msra.gmra.mrb[0].mxu1 %v174_v31 }
 0x205   :  { %v278_v35 = vpop.f32.mrb[0].mxu1 }
 0x206   :  { %v279_v36 = vadd.f32 %v421_v34, %v278_v35  ;;  %v504_v37 = vpop.f32.mrb[1].mxu1 }
 0x207   :  { %v281_v38 = vpop.f32.mrb[2].mxu1 }
 0x208   :  { %v284_v39 = vmax.f32 %v279_v36, 0.0  ;;  %v505_v40 = vpop.f32.mrb[3].mxu1 }
 0x20a   :  { %v285_v41 = vpack.c.bf16 %v284_v39, %v284_v39 }
 0x20c   :  { %523 = vmatmul.mubr.bf16.vlgmr.msra.gmra.mrb[4].mxu0 %v285_v41 }
 0x2df   :  { %v389_v43 = vpop.f32.mrb[4].mxu0 }
 0x2e0   :  { %v390_v44 = vadd.f32 %v430_v42, %v389_v43  ;;  %v524_v45 = vpop.f32.mrb[5].mxu0 }
 0x2e1   :  { %v392_v46 = vpop.f32.mrb[6].mxu0 }
 0x2e2   :  { %395 = vst [vmem:[#allocation8] sm:$0xff] %v390_v44  ;;  %v525_v47 = vpop.f32.mrb[7].mxu0 }
 0x2e3   :  { %635 = shalt.err (!%p632_p0)
}
 0x2e4   :  { %s636_s1 = scalar_lea.hbm %s801_s5, 128 }
 0x2e5   :  { %p637_p1 = scmp.ne.s32.totalorder %s801_s5, %s636_s1  ;;  %p640_p2 = scmp.lt.u32.totalorder %s636_s1, %s801_s5 }
 0x2e7   :  { %p642_p3 = pnand %p640_p2, %p637_p1 }
 0x2e9   :  { %645 = shalt.err (!%p642_p3)
}
 0x2ea   :  { %405 = dma.vmem_to_hbm [thread:$0]  %s403_s11, 128, %s801_s5, [#allocation4]  }
 0x2eb   :  { %650 = dma.done.wait [#allocation4], 128  }
 0x2ec   :  { %651 = vsyncadd [#allocation4], 4294967168 }
 0x2ed   :  { %409 = vsyncpa [#allocation3], 1 }
 0x2ee   :  { %410 = vsyncpa [#allocation6], 1 }
 0x2ef   :  { %411 = vsyncpa [#allocation4], 1 }

</bundles_post_ra>
